<compile_context>
chip_gen: v7x
topology: tpu7x:2x2x1
jax: 0.10.0
libtpu: 0.0.40
codegen_flags: <defaults>
</compile_context>

<pallas_src>
import math
from functools import partial

import jax
import jax.numpy as jnp
from jax.experimental import pallas as pl
from jax.experimental.pallas import tpu as pltpu


# ----------------------------------------------------------------------------
# Fused kernel: one batch element per grid step
# ----------------------------------------------------------------------------
def _fused_self_attention_kernel(x_ref, w_qkv_ref, b_qkv_ref, w_proj_ref,
                                 b_proj_ref, o_ref, y_ref, *, n_heads, tq, tk,
                                 approx_recip):
    # x_ref: (T, C) compute dtype, w_qkv_ref: (C, 3C), b_qkv_ref: (1, 3C) f32,
    # w_proj_ref: (C, C), b_proj_ref: (1, C) f32, o_ref: (T, C),
    # y_ref: (T, C) VMEM scratch in compute dtype.
    T, C = x_ref.shape
    H = n_heads
    D = C // H
    cd = x_ref.dtype  # compute dtype (bf16 or f32), set by the wrapper

    # QKV projection on the MXU, f32 accumulation.  The 1/sqrt(D) attention
    # scale is already folded into the q-columns of w_qkv / b_qkv.
    qkv = jnp.dot(x_ref[...], w_qkv_ref[...],
                  preferred_element_type=jnp.float32) + b_qkv_ref[...]  # (T,3C) f32
    qkv_c = qkv.astype(cd)

    num_q = T // tq

    # Heads / query tiles / kv tiles are all static -> unrolled at trace time.
    for h in range(H):
        q_h = qkv_c[:, 0 * C + h * D: 0 * C + (h + 1) * D]   # (T, D)
        k_h = qkv_c[:, 1 * C + h * D: 1 * C + (h + 1) * D]   # (T, D)
        v_h = qkv_c[:, 2 * C + h * D: 2 * C + (h + 1) * D]   # (T, D)

        for qi in range(num_q):
            q_blk = q_h[qi * tq:(qi + 1) * tq, :]             # (tq, D)

            m_i = jnp.full((tq, 1), -1e30, dtype=jnp.float32)
            l_i = jnp.zeros((tq, 1), dtype=jnp.float32)
            acc = jnp.zeros((tq, D), dtype=jnp.float32)

            # Last kv block with any unmasked element for this query tile;
            # blocks above the causal diagonal are skipped entirely.
            last_kv = ((qi + 1) * tq - 1) // tk
            for kj in range(last_kv + 1):
                k_blk = k_h[kj * tk:(kj + 1) * tk, :]          # (tk, D)
                v_blk = v_h[kj * tk:(kj + 1) * tk, :]          # (tk, D)

                # Q @ K^T without materializing a transpose of K.
                s = jax.lax.dot_general(
                    q_blk, k_blk,
                    dimension_numbers=(((1,), (1,)), ((), ())),
                    preferred_element_type=jnp.float32)        # (tq, tk) f32

                # Only blocks straddling the diagonal need a mask.
                fully_below_diag = (kj + 1) * tk - 1 <= qi * tq
                if not fully_below_diag:
                    row = (jax.lax.broadcasted_iota(jnp.int32, (tq, tk), 0)
                           + qi * tq)
                    col = (jax.lax.broadcasted_iota(jnp.int32, (tq, tk), 1)
                           + kj * tk)
                    s = jnp.where(col <= row, s, -1e30)

                # Online softmax (f32).
                m_new = jnp.maximum(m_i, jnp.max(s, axis=-1, keepdims=True))
                alpha = jnp.exp(m_i - m_new)
                p = jnp.exp(s - m_new)
                l_i = alpha * l_i + jnp.sum(p, axis=-1, keepdims=True)
                acc = alpha * acc + jnp.dot(p.astype(cd), v_blk,
                                            preferred_element_type=jnp.float32)
                m_i = m_new

            if approx_recip:
                inv_l = pl.reciprocal(l_i, approx=True)  # EUP slot
            else:
                inv_l = 1.0 / l_i
            y_ref[qi * tq:(qi + 1) * tq, h * D:(h + 1) * D] = (
                (acc * inv_l).astype(y_ref.dtype))

    # Output projection straight from the lane-dense (T, C) scratch slab.
    out = jnp.dot(y_ref[...], w_proj_ref[...],
                  preferred_element_type=jnp.float32) + b_proj_ref[...]
    o_ref[...] = out.astype(o_ref.dtype)


# ----------------------------------------------------------------------------
# Wrapper
# ----------------------------------------------------------------------------
def _largest_divisor_leq(n, cap):
    d = max(1, min(n, cap))
    while n % d:
        d -= 1
    return d


def self_attention_forward(x, params, n_heads, *, compute_dtype=jnp.float32,
                           out_dtype=None, max_q_tile=256, max_kv_tile=256,
                           approx_recip=True):
    B, T, C = x.shape
    assert C % n_heads == 0
    D = C // n_heads
    out_dtype = x.dtype if out_dtype is None else out_dtype

    # The PyTorch module projects to 4*C but `q, k, v = qkv.split(C, dim=2)`
    # only ever reads the first three chunks; drop the dead 4th chunk before
    # the kernel (25% less QKV FLOPs / weight DMA / VMEM).
    # TODO(synk): the literal PyTorch unpack of 4 chunks into 3 names would
    # raise; first-3-chunks is the only sensible interpretation.
    w_qkv = params["w_attn"][:, :3 * C]
    b_qkv = params["b_attn"][:, :3 * C]
    w_proj = params["w_proj"]
    b_proj = params["b_proj"]

    # Fold the 1/sqrt(D) attention scale into the q-columns of the QKV
    # projection (one-time transform in f32, outside the kernel).
    scale = 1.0 / math.sqrt(D)
    w_qkv = w_qkv.astype(jnp.float32).at[:, :C].multiply(scale)
    b_qkv = b_qkv.astype(jnp.float32).at[:, :C].multiply(scale)

    # Cast activations/weights to the compute dtype in the wrapper so the
    # kernel DMAs and keeps resident the narrow dtype; biases stay f32.
    x_c = x.astype(compute_dtype)
    w_qkv = w_qkv.astype(compute_dtype)
    w_proj = w_proj.astype(compute_dtype)
    b_qkv = b_qkv.astype(jnp.float32)
    b_proj = b_proj.astype(jnp.float32)

    tq = _largest_divisor_leq(T, max_q_tile)
    tk = _largest_divisor_leq(T, max_kv_tile)

    kernel = partial(_fused_self_attention_kernel, n_heads=n_heads,
                     tq=tq, tk=tk, approx_recip=approx_recip)

    return pl.pallas_call(
        kernel,
        out_shape=jax.ShapeDtypeStruct((B, T, C), out_dtype),
        grid=(B,),
        in_specs=[
            pl.BlockSpec((pl.Squeezed(), T, C), lambda b: (b, 0, 0)),  # x
            pl.BlockSpec((C, 3 * C), lambda b: (0, 0)),                # w_qkv
            pl.BlockSpec((1, 3 * C), lambda b: (0, 0)),                # b_qkv
            pl.BlockSpec((C, C), lambda b: (0, 0)),                    # w_proj
            pl.BlockSpec((1, C), lambda b: (0, 0)),                    # b_proj
        ],
        out_specs=pl.BlockSpec((pl.Squeezed(), T, C), lambda b: (b, 0, 0)),
        scratch_shapes=[pltpu.VMEM((T, C), compute_dtype)],            # y slab
        compiler_params=pltpu.CompilerParams(
            dimension_semantics=("parallel",),       # B >= 2 -> both v7x TCs
            vmem_limit_bytes=48 * 1024 * 1024,       # > v5e's 16 MiB default,
        ),                                           # < v7x's 64 MiB physical
    )(x_c, w_qkv, b_qkv, w_proj, b_proj)


# ----------------------------------------------------------------------------
# Pure-JAX reference (mirrors the PyTorch module semantics)
# ----------------------------------------------------------------------------
def reference_forward(x, params, n_heads):
    B, T, C = x.shape
    H = n_heads
    D = C // H
    qkv = x @ params["w_attn"] + params["b_attn"]
    q, k, v = (qkv[..., i * C:(i + 1) * C] for i in range(3))
    q = q.reshape(B, T, H, D).transpose(0, 2, 1, 3)
    k = k.reshape(B, T, H, D).transpose(0, 2, 1, 3)
    v = v.reshape(B, T, H, D).transpose(0, 2, 1, 3)
    s = jnp.einsum("bhqd,bhkd->bhqk", q, k) / math.sqrt(D)
    mask = jnp.tril(jnp.ones((T, T), dtype=bool))
    s = jnp.where(mask, s, -jnp.inf)
    p = jax.nn.softmax(s, axis=-1)
    y = jnp.einsum("bhqk,bhkd->bhqd", p, v)
    y = y.transpose(0, 2, 1, 3).reshape(B, T, C)
    return y @ params["w_proj"] + params["b_proj"]


# ----------------------------------------------------------------------------
# Main
# ----------------------------------------------------------------------------
if __name__ == "__main__":
    # Small config consistent with OCRConfig constraints (n_embed % n_heads == 0)
    B, T = 2, 8
    n_embed, n_heads = 32, 4

    key = jax.random.PRNGKey(0)
    kx, kw1, kb1, kw2, kb2 = jax.random.split(key, 5)

    x = jax.random.normal(kx, (B, T, n_embed), dtype=jnp.float32)
    params = {
        # stored as (in, out) so the kernel does x @ W + b
        "w_attn": 0.02 * jax.random.normal(kw1, (n_embed, 4 * n_embed), jnp.float32),
        "b_attn": 0.02 * jax.random.normal(kb1, (1, 4 * n_embed), jnp.float32),
        "w_proj": 0.02 * jax.random.normal(kw2, (n_embed, n_embed), jnp.float32),
        "b_proj": 0.02 * jax.random.normal(kb2, (1, n_embed), jnp.float32),
    }

    ref = reference_forward(x, params, n_heads)

    # f32 compute path (tight correctness check).
    fwd_f32 = jax.jit(partial(self_attention_forward, n_heads=n_heads,
                              compute_dtype=jnp.float32))
    out_f32 = jax.block_until_ready(fwd_f32(x, params))
    assert out_f32.shape == (B, T, n_embed)
    assert jnp.allclose(out_f32, ref, atol=2e-3, rtol=2e-3), "f32 mismatch vs reference"

    # bf16-input / f32-accumulate path (MXU-friendly; weights DMA'd as bf16).
    fwd_bf16 = jax.jit(partial(self_attention_forward, n_heads=n_heads,
                               compute_dtype=jnp.bfloat16))
    out_bf16 = jax.block_until_ready(fwd_bf16(x, params))
    assert jnp.allclose(out_bf16.astype(jnp.float32), ref,
                        atol=2e-2, rtol=2e-2), "bf16 mismatch vs reference"

    print("KERNEL_OK")
</pallas_src>

<mosaic_0001>
module attributes {stable_mosaic.version = 11 : i64} {
  func.func @_fused_self_attention_kernel(%arg0: i32, %arg1: memref<1x8x32xf32, #tpu.memory_space<vmem>>, %arg2: memref<32x96xf32, #tpu.memory_space<vmem>>, %arg3: memref<1x96xf32, #tpu.memory_space<vmem>>, %arg4: memref<32x32xf32, #tpu.memory_space<vmem>>, %arg5: memref<1x32xf32, #tpu.memory_space<vmem>>, %arg6: memref<1x8x32xf32, #tpu.memory_space<vmem>>, %arg7: memref<8x32xf32, #tpu.memory_space<vmem>>) attributes {dimension_semantics = [#tpu.dimension_semantics<parallel>], iteration_bounds = array<i64: 2>, scalar_prefetch = 0 : i64, scratch_operands = 1 : i64, tpu.core_type = #tpu.core_type<tc>, window_params = [{transform_indices = @transform_0, window_bounds = array<i64: 1, 8, 32>}, {pipeline_mode = #tpu.pipeline_mode<synchronous>, transform_indices = @transform_1, window_bounds = array<i64: 32, 96>}, {pipeline_mode = #tpu.pipeline_mode<synchronous>, transform_indices = @transform_2, window_bounds = array<i64: 1, 96>}, {pipeline_mode = #tpu.pipeline_mode<synchronous>, transform_indices = @transform_3, window_bounds = array<i64: 32, 32>}, {pipeline_mode = #tpu.pipeline_mode<synchronous>, transform_indices = @transform_4, window_bounds = array<i64: 1, 32>}, {transform_indices = @transform_5, window_bounds = array<i64: 1, 8, 32>}]} {
    %c0 = arith.constant 0 : index
    %c0_0 = arith.constant 0 : index
    %c0_1 = arith.constant 0 : index
    %0 = vector.load %arg1[%c0, %c0_0, %c0_1] : memref<1x8x32xf32, #tpu.memory_space<vmem>>, vector<1x8x32xf32>
    %1 = vector.shape_cast %0 : vector<1x8x32xf32> to vector<8x32xf32>
    %c0_2 = arith.constant 0 : index
    %c0_3 = arith.constant 0 : index
    %2 = vector.load %arg2[%c0_2, %c0_3] : memref<32x96xf32, #tpu.memory_space<vmem>>, vector<32x96xf32>
    %cst = arith.constant dense<0.000000e+00> : vector<8x96xf32>
    %3 = tpu.matmul %1, %2, %cst {dimension_numbers = #tpu.dot_dimension_numbers<[1], [0], [0], [1], [0, 0, 1, 1], [], []>} : vector<8x32xf32>, vector<32x96xf32>, vector<8x96xf32> -> vector<8x96xf32>
    %c0_4 = arith.constant 0 : index
    %c0_5 = arith.constant 0 : index
    %4 = vector.load %arg3[%c0_4, %c0_5] : memref<1x96xf32, #tpu.memory_space<vmem>>, vector<1x96xf32>
    %5 = vector.broadcast %4 : vector<1x96xf32> to vector<8x96xf32>
    %6 = arith.addf %3, %5 : vector<8x96xf32>
    %7 = vector.extract_strided_slice %6 {offsets = [0, 0], sizes = [8, 8], strides = [1, 1]} : vector<8x96xf32> to vector<8x8xf32>
    %8 = vector.extract_strided_slice %6 {offsets = [0, 32], sizes = [8, 8], strides = [1, 1]} : vector<8x96xf32> to vector<8x8xf32>
    %9 = vector.extract_strided_slice %6 {offsets = [0, 64], sizes = [8, 8], strides = [1, 1]} : vector<8x96xf32> to vector<8x8xf32>
    %cst_6 = arith.constant -1.000000e+30 : f32
    %10 = vector.broadcast %cst_6 : f32 to vector<8x1xf32>
    %cst_7 = arith.constant 0.000000e+00 : f32
    %11 = vector.broadcast %cst_7 : f32 to vector<8x1xf32>
    %cst_8 = arith.constant 0.000000e+00 : f32
    %12 = vector.broadcast %cst_8 : f32 to vector<8x8xf32>
    %cst_9 = arith.constant dense<0.000000e+00> : vector<8x8xf32>
    %13 = tpu.matmul %7, %8, %cst_9 {dimension_numbers = #tpu.dot_dimension_numbers<[1], [1], [0], [0], [0, 0, 1, 0], [], []>} : vector<8x8xf32>, vector<8x8xf32>, vector<8x8xf32> -> vector<8x8xf32>
    %14 = tpu.iota {dimensions = array<i32: 0>} : vector<8x8xi32>
    %c0_i32 = arith.constant 0 : i32
    %15 = vector.broadcast %c0_i32 : i32 to vector<8x8xi32>
    %16 = arith.addi %14, %15 : vector<8x8xi32>
    %17 = tpu.iota {dimensions = array<i32: 1>} : vector<8x8xi32>
    %c0_i32_10 = arith.constant 0 : i32
    %18 = vector.broadcast %c0_i32_10 : i32 to vector<8x8xi32>
    %19 = arith.addi %17, %18 : vector<8x8xi32>
    %20 = arith.cmpi sle, %19, %16 : vector<8x8xi32>
    %cst_11 = arith.constant -1.000000e+30 : f32
    %21 = vector.broadcast %cst_11 : f32 to vector<8x8xf32>
    %22 = arith.select %20, %13, %21 : vector<8x8xi1>, vector<8x8xf32>
    %cst_12 = arith.constant dense<0xFF800000> : vector<8xf32>
    %23 = vector.multi_reduction <maximumf>, %22, %cst_12 [1] : vector<8x8xf32> to vector<8xf32>
    %24 = vector.shape_cast %23 : vector<8xf32> to vector<8x1xf32>
    %25 = arith.maximumf %10, %24 : vector<8x1xf32>
    %26 = arith.subf %10, %25 : vector<8x1xf32>
    %27 = math.exp %26 : vector<8x1xf32>
    %28 = vector.broadcast %25 : vector<8x1xf32> to vector<8x8xf32>
    %29 = arith.subf %22, %28 : vector<8x8xf32>
    %30 = math.exp %29 : vector<8x8xf32>
    %31 = arith.mulf %27, %11 : vector<8x1xf32>
    %cst_13 = arith.constant dense<0.000000e+00> : vector<8xf32>
    %32 = vector.multi_reduction <add>, %30, %cst_13 [1] : vector<8x8xf32> to vector<8xf32>
    %33 = vector.shape_cast %32 : vector<8xf32> to vector<8x1xf32>
    %34 = arith.addf %31, %33 : vector<8x1xf32>
    %35 = vector.broadcast %27 : vector<8x1xf32> to vector<8x8xf32>
    %36 = arith.mulf %35, %12 : vector<8x8xf32>
    %cst_14 = arith.constant dense<0.000000e+00> : vector<8x8xf32>
    %37 = tpu.matmul %30, %9, %cst_14 {dimension_numbers = #tpu.dot_dimension_numbers<[1], [0], [0], [1], [0, 0, 1, 1], [], []>} : vector<8x8xf32>, vector<8x8xf32>, vector<8x8xf32> -> vector<8x8xf32>
    %38 = arith.addf %36, %37 : vector<8x8xf32>
    %39 = tpu.reciprocal %34 {approx = true} : vector<8x1xf32> -> vector<8x1xf32>
    %40 = vector.broadcast %39 : vector<8x1xf32> to vector<8x8xf32>
    %41 = arith.mulf %38, %40 : vector<8x8xf32>
    %c0_15 = arith.constant 0 : index
    %c0_16 = arith.constant 0 : index
    %42 = vector.load %arg7[%c0_15, %c0_16] : memref<8x32xf32, #tpu.memory_space<vmem>>, vector<8x8xf32>
    tpu.vector_store %arg7[%c0_15, %c0_16], %41 {strides = array<i32>} : memref<8x32xf32, #tpu.memory_space<vmem>>, vector<8x8xf32>,
    %43 = vector.extract_strided_slice %6 {offsets = [0, 8], sizes = [8, 8], strides = [1, 1]} : vector<8x96xf32> to vector<8x8xf32>
    %44 = vector.extract_strided_slice %6 {offsets = [0, 40], sizes = [8, 8], strides = [1, 1]} : vector<8x96xf32> to vector<8x8xf32>
    %45 = vector.extract_strided_slice %6 {offsets = [0, 72], sizes = [8, 8], strides = [1, 1]} : vector<8x96xf32> to vector<8x8xf32>
    %cst_17 = arith.constant -1.000000e+30 : f32
    %46 = vector.broadcast %cst_17 : f32 to vector<8x1xf32>
    %cst_18 = arith.constant 0.000000e+00 : f32
    %47 = vector.broadcast %cst_18 : f32 to vector<8x1xf32>
    %cst_19 = arith.constant 0.000000e+00 : f32
    %48 = vector.broadcast %cst_19 : f32 to vector<8x8xf32>
    %cst_20 = arith.constant dense<0.000000e+00> : vector<8x8xf32>
    %49 = tpu.matmul %43, %44, %cst_20 {dimension_numbers = #tpu.dot_dimension_numbers<[1], [1], [0], [0], [0, 0, 1, 0], [], []>} : vector<8x8xf32>, vector<8x8xf32>, vector<8x8xf32> -> vector<8x8xf32>
    %50 = tpu.iota {dimensions = array<i32: 0>} : vector<8x8xi32>
    %c0_i32_21 = arith.constant 0 : i32
    %51 = vector.broadcast %c0_i32_21 : i32 to vector<8x8xi32>
    %52 = arith.addi %50, %51 : vector<8x8xi32>
    %53 = tpu.iota {dimensions = array<i32: 1>} : vector<8x8xi32>
    %c0_i32_22 = arith.constant 0 : i32
    %54 = vector.broadcast %c0_i32_22 : i32 to vector<8x8xi32>
    %55 = arith.addi %53, %54 : vector<8x8xi32>
    %56 = arith.cmpi sle, %55, %52 : vector<8x8xi32>
    %cst_23 = arith.constant -1.000000e+30 : f32
    %57 = vector.broadcast %cst_23 : f32 to vector<8x8xf32>
    %58 = arith.select %56, %49, %57 : vector<8x8xi1>, vector<8x8xf32>
    %cst_24 = arith.constant dense<0xFF800000> : vector<8xf32>
    %59 = vector.multi_reduction <maximumf>, %58, %cst_24 [1] : vector<8x8xf32> to vector<8xf32>
    %60 = vector.shape_cast %59 : vector<8xf32> to vector<8x1xf32>
    %61 = arith.maximumf %46, %60 : vector<8x1xf32>
    %62 = arith.subf %46, %61 : vector<8x1xf32>
    %63 = math.exp %62 : vector<8x1xf32>
    %64 = vector.broadcast %61 : vector<8x1xf32> to vector<8x8xf32>
    %65 = arith.subf %58, %64 : vector<8x8xf32>
    %66 = math.exp %65 : vector<8x8xf32>
    %67 = arith.mulf %63, %47 : vector<8x1xf32>
    %cst_25 = arith.constant dense<0.000000e+00> : vector<8xf32>
    %68 = vector.multi_reduction <add>, %66, %cst_25 [1] : vector<8x8xf32> to vector<8xf32>
    %69 = vector.shape_cast %68 : vector<8xf32> to vector<8x1xf32>
    %70 = arith.addf %67, %69 : vector<8x1xf32>
    %71 = vector.broadcast %63 : vector<8x1xf32> to vector<8x8xf32>
    %72 = arith.mulf %71, %48 : vector<8x8xf32>
    %cst_26 = arith.constant dense<0.000000e+00> : vector<8x8xf32>
    %73 = tpu.matmul %66, %45, %cst_26 {dimension_numbers = #tpu.dot_dimension_numbers<[1], [0], [0], [1], [0, 0, 1, 1], [], []>} : vector<8x8xf32>, vector<8x8xf32>, vector<8x8xf32> -> vector<8x8xf32>
    %74 = arith.addf %72, %73 : vector<8x8xf32>
    %75 = tpu.reciprocal %70 {approx = true} : vector<8x1xf32> -> vector<8x1xf32>
    %76 = vector.broadcast %75 : vector<8x1xf32> to vector<8x8xf32>
    %77 = arith.mulf %74, %76 : vector<8x8xf32>
    %c0_27 = arith.constant 0 : index
    %c8 = arith.constant 8 : index
    %78 = vector.load %arg7[%c0_27, %c8] : memref<8x32xf32, #tpu.memory_space<vmem>>, vector<8x8xf32>
    tpu.vector_store %arg7[%c0_27, %c8], %77 {strides = array<i32>} : memref<8x32xf32, #tpu.memory_space<vmem>>, vector<8x8xf32>,
    %79 = vector.extract_strided_slice %6 {offsets = [0, 16], sizes = [8, 8], strides = [1, 1]} : vector<8x96xf32> to vector<8x8xf32>
    %80 = vector.extract_strided_slice %6 {offsets = [0, 48], sizes = [8, 8], strides = [1, 1]} : vector<8x96xf32> to vector<8x8xf32>
    %81 = vector.extract_strided_slice %6 {offsets = [0, 80], sizes = [8, 8], strides = [1, 1]} : vector<8x96xf32> to vector<8x8xf32>
    %cst_28 = arith.constant -1.000000e+30 : f32
    %82 = vector.broadcast %cst_28 : f32 to vector<8x1xf32>
    %cst_29 = arith.constant 0.000000e+00 : f32
    %83 = vector.broadcast %cst_29 : f32 to vector<8x1xf32>
    %cst_30 = arith.constant 0.000000e+00 : f32
    %84 = vector.broadcast %cst_30 : f32 to vector<8x8xf32>
    %cst_31 = arith.constant dense<0.000000e+00> : vector<8x8xf32>
    %85 = tpu.matmul %79, %80, %cst_31 {dimension_numbers = #tpu.dot_dimension_numbers<[1], [1], [0], [0], [0, 0, 1, 0], [], []>} : vector<8x8xf32>, vector<8x8xf32>, vector<8x8xf32> -> vector<8x8xf32>
    %86 = tpu.iota {dimensions = array<i32: 0>} : vector<8x8xi32>
    %c0_i32_32 = arith.constant 0 : i32
    %87 = vector.broadcast %c0_i32_32 : i32 to vector<8x8xi32>
    %88 = arith.addi %86, %87 : vector<8x8xi32>
    %89 = tpu.iota {dimensions = array<i32: 1>} : vector<8x8xi32>
    %c0_i32_33 = arith.constant 0 : i32
    %90 = vector.broadcast %c0_i32_33 : i32 to vector<8x8xi32>
    %91 = arith.addi %89, %90 : vector<8x8xi32>
    %92 = arith.cmpi sle, %91, %88 : vector<8x8xi32>
    %cst_34 = arith.constant -1.000000e+30 : f32
    %93 = vector.broadcast %cst_34 : f32 to vector<8x8xf32>
    %94 = arith.select %92, %85, %93 : vector<8x8xi1>, vector<8x8xf32>
    %cst_35 = arith.constant dense<0xFF800000> : vector<8xf32>
    %95 = vector.multi_reduction <maximumf>, %94, %cst_35 [1] : vector<8x8xf32> to vector<8xf32>
    %96 = vector.shape_cast %95 : vector<8xf32> to vector<8x1xf32>
    %97 = arith.maximumf %82, %96 : vector<8x1xf32>
    %98 = arith.subf %82, %97 : vector<8x1xf32>
    %99 = math.exp %98 : vector<8x1xf32>
    %100 = vector.broadcast %97 : vector<8x1xf32> to vector<8x8xf32>
    %101 = arith.subf %94, %100 : vector<8x8xf32>
    %102 = math.exp %101 : vector<8x8xf32>
    %103 = arith.mulf %99, %83 : vector<8x1xf32>
    %cst_36 = arith.constant dense<0.000000e+00> : vector<8xf32>
    %104 = vector.multi_reduction <add>, %102, %cst_36 [1] : vector<8x8xf32> to vector<8xf32>
    %105 = vector.shape_cast %104 : vector<8xf32> to vector<8x1xf32>
    %106 = arith.addf %103, %105 : vector<8x1xf32>
    %107 = vector.broadcast %99 : vector<8x1xf32> to vector<8x8xf32>
    %108 = arith.mulf %107, %84 : vector<8x8xf32>
    %cst_37 = arith.constant dense<0.000000e+00> : vector<8x8xf32>
    %109 = tpu.matmul %102, %81, %cst_37 {dimension_numbers = #tpu.dot_dimension_numbers<[1], [0], [0], [1], [0, 0, 1, 1], [], []>} : vector<8x8xf32>, vector<8x8xf32>, vector<8x8xf32> -> vector<8x8xf32>
    %110 = arith.addf %108, %109 : vector<8x8xf32>
    %111 = tpu.reciprocal %106 {approx = true} : vector<8x1xf32> -> vector<8x1xf32>
    %112 = vector.broadcast %111 : vector<8x1xf32> to vector<8x8xf32>
    %113 = arith.mulf %110, %112 : vector<8x8xf32>
    %c0_38 = arith.constant 0 : index
    %c16 = arith.constant 16 : index
    %114 = vector.load %arg7[%c0_38, %c16] : memref<8x32xf32, #tpu.memory_space<vmem>>, vector<8x8xf32>
    tpu.vector_store %arg7[%c0_38, %c16], %113 {strides = array<i32>} : memref<8x32xf32, #tpu.memory_space<vmem>>, vector<8x8xf32>,
    %115 = vector.extract_strided_slice %6 {offsets = [0, 24], sizes = [8, 8], strides = [1, 1]} : vector<8x96xf32> to vector<8x8xf32>
    %116 = vector.extract_strided_slice %6 {offsets = [0, 56], sizes = [8, 8], strides = [1, 1]} : vector<8x96xf32> to vector<8x8xf32>
    %117 = vector.extract_strided_slice %6 {offsets = [0, 88], sizes = [8, 8], strides = [1, 1]} : vector<8x96xf32> to vector<8x8xf32>
    %cst_39 = arith.constant -1.000000e+30 : f32
    %118 = vector.broadcast %cst_39 : f32 to vector<8x1xf32>
    %cst_40 = arith.constant 0.000000e+00 : f32
    %119 = vector.broadcast %cst_40 : f32 to vector<8x1xf32>
    %cst_41 = arith.constant 0.000000e+00 : f32
    %120 = vector.broadcast %cst_41 : f32 to vector<8x8xf32>
    %cst_42 = arith.constant dense<0.000000e+00> : vector<8x8xf32>
    %121 = tpu.matmul %115, %116, %cst_42 {dimension_numbers = #tpu.dot_dimension_numbers<[1], [1], [0], [0], [0, 0, 1, 0], [], []>} : vector<8x8xf32>, vector<8x8xf32>, vector<8x8xf32> -> vector<8x8xf32>
    %122 = tpu.iota {dimensions = array<i32: 0>} : vector<8x8xi32>
    %c0_i32_43 = arith.constant 0 : i32
    %123 = vector.broadcast %c0_i32_43 : i32 to vector<8x8xi32>
    %124 = arith.addi %122, %123 : vector<8x8xi32>
    %125 = tpu.iota {dimensions = array<i32: 1>} : vector<8x8xi32>
    %c0_i32_44 = arith.constant 0 : i32
    %126 = vector.broadcast %c0_i32_44 : i32 to vector<8x8xi32>
    %127 = arith.addi %125, %126 : vector<8x8xi32>
    %128 = arith.cmpi sle, %127, %124 : vector<8x8xi32>
    %cst_45 = arith.constant -1.000000e+30 : f32
    %129 = vector.broadcast %cst_45 : f32 to vector<8x8xf32>
    %130 = arith.select %128, %121, %129 : vector<8x8xi1>, vector<8x8xf32>
    %cst_46 = arith.constant dense<0xFF800000> : vector<8xf32>
    %131 = vector.multi_reduction <maximumf>, %130, %cst_46 [1] : vector<8x8xf32> to vector<8xf32>
    %132 = vector.shape_cast %131 : vector<8xf32> to vector<8x1xf32>
    %133 = arith.maximumf %118, %132 : vector<8x1xf32>
    %134 = arith.subf %118, %133 : vector<8x1xf32>
    %135 = math.exp %134 : vector<8x1xf32>
    %136 = vector.broadcast %133 : vector<8x1xf32> to vector<8x8xf32>
    %137 = arith.subf %130, %136 : vector<8x8xf32>
    %138 = math.exp %137 : vector<8x8xf32>
    %139 = arith.mulf %135, %119 : vector<8x1xf32>
    %cst_47 = arith.constant dense<0.000000e+00> : vector<8xf32>
    %140 = vector.multi_reduction <add>, %138, %cst_47 [1] : vector<8x8xf32> to vector<8xf32>
    %141 = vector.shape_cast %140 : vector<8xf32> to vector<8x1xf32>
    %142 = arith.addf %139, %141 : vector<8x1xf32>
    %143 = vector.broadcast %135 : vector<8x1xf32> to vector<8x8xf32>
    %144 = arith.mulf %143, %120 : vector<8x8xf32>
    %cst_48 = arith.constant dense<0.000000e+00> : vector<8x8xf32>
    %145 = tpu.matmul %138, %117, %cst_48 {dimension_numbers = #tpu.dot_dimension_numbers<[1], [0], [0], [1], [0, 0, 1, 1], [], []>} : vector<8x8xf32>, vector<8x8xf32>, vector<8x8xf32> -> vector<8x8xf32>
    %146 = arith.addf %144, %145 : vector<8x8xf32>
    %147 = tpu.reciprocal %142 {approx = true} : vector<8x1xf32> -> vector<8x1xf32>
    %148 = vector.broadcast %147 : vector<8x1xf32> to vector<8x8xf32>
    %149 = arith.mulf %146, %148 : vector<8x8xf32>
    %c0_49 = arith.constant 0 : index
    %c24 = arith.constant 24 : index
    %150 = vector.load %arg7[%c0_49, %c24] : memref<8x32xf32, #tpu.memory_space<vmem>>, vector<8x8xf32>
    tpu.vector_store %arg7[%c0_49, %c24], %149 {strides = array<i32>} : memref<8x32xf32, #tpu.memory_space<vmem>>, vector<8x8xf32>,
    %c0_50 = arith.constant 0 : index
    %c0_51 = arith.constant 0 : index
    %151 = vector.load %arg7[%c0_50, %c0_51] : memref<8x32xf32, #tpu.memory_space<vmem>>, vector<8x32xf32>
    %c0_52 = arith.constant 0 : index
    %c0_53 = arith.constant 0 : index
    %152 = vector.load %arg4[%c0_52, %c0_53] : memref<32x32xf32, #tpu.memory_space<vmem>>, vector<32x32xf32>
    %cst_54 = arith.constant dense<0.000000e+00> : vector<8x32xf32>
    %153 = tpu.matmul %151, %152, %cst_54 {dimension_numbers = #tpu.dot_dimension_numbers<[1], [0], [0], [1], [0, 0, 1, 1], [], []>} : vector<8x32xf32>, vector<32x32xf32>, vector<8x32xf32> -> vector<8x32xf32>
    %c0_55 = arith.constant 0 : index
    %c0_56 = arith.constant 0 : index
    %154 = vector.load %arg5[%c0_55, %c0_56] : memref<1x32xf32, #tpu.memory_space<vmem>>, vector<1x32xf32>
    %155 = vector.broadcast %154 : vector<1x32xf32> to vector<8x32xf32>
    %156 = arith.addf %153, %155 : vector<8x32xf32>
    %c0_57 = arith.constant 0 : index
    %c0_58 = arith.constant 0 : index
    %c0_59 = arith.constant 0 : index
    %157 = vector.load %arg6[%c0_57, %c0_58, %c0_59] : memref<1x8x32xf32, #tpu.memory_space<vmem>>, vector<1x8x32xf32>
    %158 = vector.shape_cast %157 : vector<1x8x32xf32> to vector<8x32xf32>
    %159 = vector.shape_cast %156 : vector<8x32xf32> to vector<1x8x32xf32>
    tpu.vector_store %arg6[%c0_57, %c0_58, %c0_59], %159 {strides = array<i32>} : memref<1x8x32xf32, #tpu.memory_space<vmem>>, vector<1x8x32xf32>,
    return
  }
  func.func @transform_0(%arg0: i32) -> (i32, i32, i32) {
    %c0_i32 = arith.constant 0 : i32
    %c0_i32_0 = arith.constant 0 : i32
    %c0_i32_1 = arith.constant 0 : i32
    return %arg0, %c0_i32, %c0_i32_0 : i32, i32, i32
  }
  func.func @transform_1(%arg0: i32) -> (i32, i32) {
    %c0_i32 = arith.constant 0 : i32
    %c0_i32_0 = arith.constant 0 : i32
    %c0_i32_1 = arith.constant 0 : i32
    return %c0_i32, %c0_i32_0 : i32, i32
  }
  func.func @transform_2(%arg0: i32) -> (i32, i32) {
    %c0_i32 = arith.constant 0 : i32
    %c0_i32_0 = arith.constant 0 : i32
    %c0_i32_1 = arith.constant 0 : i32
    return %c0_i32, %c0_i32_0 : i32, i32
  }
  func.func @transform_3(%arg0: i32) -> (i32, i32) {
    %c0_i32 = arith.constant 0 : i32
    %c0_i32_0 = arith.constant 0 : i32
    %c0_i32_1 = arith.constant 0 : i32
    return %c0_i32, %c0_i32_0 : i32, i32
  }
  func.func @transform_4(%arg0: i32) -> (i32, i32) {
    %c0_i32 = arith.constant 0 : i32
    %c0_i32_0 = arith.constant 0 : i32
    %c0_i32_1 = arith.constant 0 : i32
    return %c0_i32, %c0_i32_0 : i32, i32
  }
  func.func @transform_5(%arg0: i32) -> (i32, i32, i32) {
    %c0_i32 = arith.constant 0 : i32
    %c0_i32_0 = arith.constant 0 : i32
    %c0_i32_1 = arith.constant 0 : i32
    return %arg0, %c0_i32, %c0_i32_0 : i32, i32, i32
  }
}

</mosaic_0001>

<bundles_post_ra>
// kernel: self_attention_forward.1
= control target key start
LH: loop header
LB: loop body
LE: loop exit
PB: predicated region body
PF: predicated region fallthrough
CT: control target
= control target key end

     0   :  { %10 = vsyncpa [#allocation4], 0  ;;  %s1703_s0 = inlined_call_operand.vmem [shape: f32[2,8,32], index: 0, kind: input, shape index: {}]   ;;  %s1704_s1 = inlined_call_operand.vmem [shape: f32[32,96], index: 1, kind: input, shape index: {}]   ;;  %s1705_s2 = inlined_call_operand.vmem [shape: f32[1,96], index: 2, kind: input, shape index: {}]   ;;  %s1706_s3 = inlined_call_operand.vmem [shape: f32[32,32], index: 3, kind: input, shape index: {}]   ;;  %s1707_s4 = inlined_call_operand.vmem [shape: f32[1,32], index: 4, kind: input, shape index: {}]   ;;  %s1708_s5 = inlined_call_operand.hbm [shape: f32[2,8,32], index: 5, kind: output, shape index: {}]  }
   0x1   :  { %12 = vsyncpa [#allocation4 + $0x1], 0  ;;  %s1499_s18 = smov 0   ;;  %s1501_s19 = smov 0  }
   0x2   :  { %s1503_s20 = smov 0   ;;  %s1505_s21 = smov 0  }
   0x3 LB: > { %s1520_s22 = sadd.s32 4294967295, %s1449_s21   ;;  %s1181_s23 = sadd.s32 4294967294, %s1449_s21   ;;  %s1449_s21 = sphi %s1505_s21, %s1714_s21   ;;  %s1445_s20 = sphi %s1503_s20, %s1713_s20   ;;  %s1441_s19 = sphi %s1501_s19, %s1712_s19   ;;  %s1437_s18 = sphi %s1499_s18, %s1711_s18  }
   0x4   : > { %s1524_s24 = sadd.s32 1, %s1449_s21   ;;  %s135_s25 = sadd.s32 1, %s1445_s20 }
   0x5   : > { %s132_s26 = ssub.s32 %s1449_s21, %s1524_s24  ;;  %p145_p0 = scmp.ne.s32.totalorder %s1445_s20, %s1441_s19 }
   0x6   : > { %p133_p1 = scmp.eq.s32.totalorder %s132_s26, 0  ;;  %p146_p2 = scmp.eq.s32.totalorder %s1520_s22, 1 }
   0x7   : > { %p151_p3 = scmp.ne.s32.totalorder %s1441_s19, %s1437_s18  ;;  %p152_p4 = scmp.eq.s32.totalorder %s1181_s23, 1 }
   0x8   : > { %s1535_s27 = scalar_select %p133_p1, %s1445_s20, %s135_s25  }
   0x9   : > { %p1537_p5 = por %p146_p2, %p145_p0  ;;  %p1541_p6 = por %p152_p4, %p151_p3 }
   0xa   : > { %p1184_p7 = scmp.ge.s32.totalorder %s1449_s21, 1  ;;  %p189_p8 = scmp.lt.s32.totalorder %s1449_s21, 3 }
   0xc   : > { %p190_p9 = pnand %p1184_p7, %p189_p8 }
   0xd   : > { %v221_v0 = vld [vmem:[%s1704_s1] sm:$0xff] (!%p190_p9)  ;;  %v222_v1 = vld [vmem:[%s1704_s1 + $0x8] sm:$0xff] (!%p190_p9)  ;;  %v223_v2 = vld [vmem:[%s1704_s1 + $0x10] sm:$0xff] (!%p190_p9)  ;;  %v1451_v3 = vmov (!%p190_p9), 0.0|0.0   ;;  %vm1452_vm0 = vmmov (!%p190_p9), 0   ;;  %v1453_v6 = vmov (!%p190_p9), 0.0   ;;  %v384_v21 = vlaneseq (!%p190_p9) }
   0xe   : > { %193 = sbr.rel (%p190_p9) target bundleno = 1683 (0x693), region = 40  ;;  %1295 = vmatprep.subr.bf16.mxu0 (!%p190_p9), %v1451_v3  ;;  %v1296_v4 = vpack.c.bf16 (!%p190_p9), %v222_v1, %v221_v0  ;;  %v224_v5 = vld [vmem:[%s1704_s1 + $0x18] sm:$0xff] (!%p190_p9)  ;;  %1241 = vmatprep.mubr.msk.f32.mxu0 (!%p190_p9), %vm1452_vm0, %v1453_v6  ;;  %p216_p10 = scmp.lt.s32.totalorder (!%p190_p9), %s1520_s22, 1  ;;  %vm232_vm1 = vcmask (!%p190_p9), 261120   ;;  %v1187_v9 = vld [vmem:[%s1705_s2] ss:$0 sm:$0xff] (!%p190_p9) }
   0xf   : > { %1244 = vmatprep.subr.mxu1 (!%p190_p9), %v1453_v6  ;;  %1246 = vmatprep.mubr.msk.f32.mxu1 (!%p190_p9), %vm1452_vm0, %v1453_v6  ;;  %v1299_v7 = vpack.c.bf16 (!%p190_p9), %v224_v5, %v223_v2  ;;  %s1454_s26 = smov (!%p190_p9), 64   ;;  %s1455_s30 = smov (!%p190_p9), 96   ;;  %vm309_vm2 = vcmask (!%p190_p9), 64512   ;;  %v385_v22 = vshrl.u32 (!%p190_p9), %v384_v21, 7  ;;  %v387_v23 = vand.u32 (!%p190_p9), 127, %v384_v21 }
  0x10   : > { %1297 = vmatpush3.bf16.msra.mxu0 (!%p190_p9), %v1296_v4  ;;  %s1456_s6 = smov (!%p190_p9), 88   ;;  %s1457_s7 = smov (!%p190_p9), 120   ;;  %vm662_vm4 = vcmask (!%p190_p9), 130112   ;;  %vm841_vm5 = vcmask (!%p190_p9), 195712   ;;  %vm1020_vm6 = vcmask (!%p190_p9), 261312  }
  0x11   : > { %1298 = vmatprep.subr.bf16.mxu0 (!%p190_p9), %v1451_v3  ;;  %s1458_s8 = smov (!%p190_p9), 80   ;;  %s1459_s9 = smov (!%p190_p9), 112   ;;  %vm388_vm3 = vcmp.le.s32.totalorder (!%p190_p9), %v387_v23, %v385_v22 }
  0x12   : > { %s1460_s10 = smov (!%p190_p9), 72   ;;  %s1461_s11 = smov (!%p190_p9), 104  }
  0x13   : > { %s1462_s12 = smov (!%p190_p9), 56  }
  0x14   : > { %1300 = vmatpush3.bf16.msra.mxu0 (!%p190_p9), %v1299_v7 }
  0x15   : > { %s217_s13 = scalar_select %p216_p10, %s1520_s22, 1  ;;  %1264 = vmatprep.subr.mxu0 %v1453_v6 }
  0x17   : > { %s1186_s14 = sshll.u32 %s217_s13, 3  ;;  %s1463_s13 = smov 40  }
  0x18   : > { %s219_s17 = scalar_lea.vmem %s1703_s0, %s1186_s14  ;;  %s1464_s14 = smov 48  }
  0x19   : > { %v220_v8 = vld [vmem:[%s219_s17] sm:$0xff] }
  0x1a   : > { %1242 = vmatmul.mubr.msk.f32.vlgmr.msra.gmra.mrb[0].mxu0 %vm232_vm1, %v220_v8 }
  0x1b   : > { %1266 = vmatprep.mubr.msk.f32.mxu0 %vm1452_vm0, %v1453_v6 }
  0xed   : > { %v302_v10 = vpop.f32.mrb[0].mxu0 }
  0xee   : > { %v1578_v11 = vadd.f32 %v1187_v9, %v302_v10  ;;  %v1243_v12 = vpop.f32.mrb[1].mxu0 }
  0xf0   : > { %405 = vrot.lane.b32.xlu1 %v1578_v11, %s1454_s26  ;;  %307 = vrot.lane.b32.xlu0 %v1578_v11, %s1455_s30 }
  0xf4   : > { %487 = vrot.lane.b32.xlu1 %v1578_v11, %s1456_s6 }
  0xf8   : > { %485 = vrot.lane.b32.xlu1 %v1578_v11, %s1457_s7  ;;  %s1465_s7 = smov 8  }
  0xfc   : > { %666 = vrot.lane.b32.xlu1 %v1578_v11, %s1458_s8  ;;  %s1466_s8 = smov 16  }
 0x100   : > { %664 = vrot.lane.b32.xlu1 %v1578_v11, %s1459_s9  ;;  %s1467_s9 = smov 24  }
 0x104   : > { %845 = vrot.lane.b32.xlu1 %v1578_v11, %s1460_s10  ;;  %s213_s10 = sand.u32 1, %s1441_s19  }
 0x105   : > { %s1109_s26 = scalar_lea.sflag [#allocation4], %s213_s10 }
 0x108   : > { %843 = vrot.lane.b32.xlu1 %v1578_v11, %s1461_s11  ;;  %s1185_s11 = sshll.u32 %s213_s10, 3 }
 0x109   : > { %s215_s15 = scalar_lea.vmem [#allocation3], %s1185_s11 }
 0x10a   : > { %s1122_s16 = sshll.u32 %s215_s15, 4  ;;  %s1662_s16 = int_to_ptr.vmem [resolvable:$true] %s1122_s16 }
 0x10b   : > { %s1387_s30 = scalar_lea.vmem %s1662_s16, 128 }
 0x10c   : > { %p1388_p11 = scmp.ne.s32.totalorder %s1662_s16, %s1387_s30 }
 0x10e   : > { %p1389_p12 = pnand %p1388_p11, %p1537_p5 }
 0x110   : > { %p1390_p13 = pneg %p1389_p12 }
 0x162   : > { %v406_v13 = vpop.permute.xlu1 %405  ;;  %v308_v14 = vpop.permute.xlu0 %307 }
 0x163   : > { %1245 = vmatpush3.xpose.msk.msra.mxu1 %vm309_vm2, %v308_v14 }
 0x164   : > { %1249 = vmatprep.subr.mxu1 %v1453_v6 }
 0x166   : > { %v488_v15 = vpop.permute.xlu1 %487  ;;  %1247 = vmatmul.mubr.msk.f32.vlgmr.msra.gmra.mrb[0].mxu1 %vm309_vm2, %v1578_v11 }
 0x167   : > { %1250 = vmatpush3.msra.mxu1 %v406_v13  ;;  %1251 = vmatprep.mubr.msk.f32.mxu1 %vm1452_vm0, %v1453_v6 }
 0x168   : > { %1254 = vmatprep.subr.mxu1 %v1453_v6 }
 0x16a   : > { %v486_v16 = vpop.permute.xlu1 %485 }
 0x16e   : > { %v667_v17 = vpop.permute.xlu1 %666 }
 0x16f   : > { %1265 = vmatpush3.xpose.msk.msra.mxu0 %vm309_vm2, %v667_v17 }
 0x170   : > { %1274 = vmatprep.subr.mxu0 %v1453_v6 }
 0x172   : > { %v665_v18 = vpop.permute.xlu1 %664 }
 0x173   : > { %1267 = vmatmul.mubr.msk.f32.vlgmr.msra.gmra.mrb[2].mxu0 %vm309_vm2, %v665_v18 }
 0x174   : > { %1276 = vmatprep.mubr.msk.f32.mxu0 %vm1452_vm0, %v1453_v6 }
 0x176   : > { %v846_v19 = vpop.permute.xlu1 %845 }
 0x177   : > { %1275 = vmatpush3.xpose.msk.msra.mxu0 %vm309_vm2, %v846_v19 }
 0x178   : > { %1301 = vmatprep.subr.bf16.mxu0 %v1451_v3 }
 0x17a   : > { %v844_v20 = vpop.permute.xlu1 %843 }
 0x17b   : > { %1277 = vmatmul.mubr.msk.f32.vlgmr.msra.gmra.mrb[4].mxu0 %vm309_vm2, %v844_v20 }
 0x17c   : > { %1292 = vmatprep.mubr.msk.f32.mxu0 %vm1452_vm0, %v1453_v6 }
 0x239   : > { %v380_v24 = vpop.f32.mrb[0].mxu1 }
 0x23a   : > { %v389_v25 = vsel %vm388_vm3, %v380_v24, -1e+30  ;;  %v1248_v26 = vpop.f32.mrb[1].mxu1 }
 0x23b   : > { %v390_v27 = vsel %vm309_vm2, %v389_v25, -inf }
 0x23c   : > { %391 = vmax.xlane.f32.xlu0 %v390_v27 }
 0x246   : > { %v738_v28 = vpop.f32.mrb[2].mxu0 }
 0x247   : > { %v1268_v29 = vpop.f32.mrb[3].mxu0  ;;  %v742_v32 = vsel %vm388_vm3, %v738_v28, -1e+30 }
 0x248   : > { %v743_v33 = vsel %vm309_vm2, %v742_v32, -inf }
 0x24e   : > { %v917_v30 = vpop.f32.mrb[4].mxu0 }
 0x24f   : > { %v1278_v31 = vpop.f32.mrb[5].mxu0  ;;  %v921_v34 = vsel %vm388_vm3, %v917_v30, -1e+30 }
 0x250   : > { %v922_v35 = vsel %vm309_vm2, %v921_v34, -inf }
 0x252   : > { %579 = vrot.lane.b32.xlu0 %v1578_v11, %s1462_s12 }
 0x271   : > { %744 = vmax.xlane.f32.xlu0 %v743_v33  ;;  %v1023_v33 = vld [vmem:[%s1706_s3] sm:$0xff] }
 0x275   : > { %923 = vmax.xlane.f32.xlu0 %v922_v35 }
 0x28b   : > { %937 = vrot.lane.b32.xlu0 %v1578_v11, %s1463_s13 }
 0x2c9   : > { %v392_v36 = vpop.xlane.xlu0 %391 }
 0x2ca   : > { %v393_v37 = vmax.f32 %v392_v36, -1e+30 }
 0x2cc   : > { %v397_v38 = vsub.f32 %v389_v25, %v393_v37  ;;  %v394_v42 = vsub.f32 -1e+30, %v393_v37  ;;  %v1025_v37 = vld [vmem:[%s1706_s3 + $0x10] sm:$0xff] }
 0x2cd   : > { %v580_v41 = vpop.permute.xlu0 %579 }
 0x2ce   : > { %v398_v39 = vmul.f32 1.442695, %v397_v38  ;;  %v395_v43 = vmul.f32 1.442695, %v394_v42  ;;  %v1026_v38 = vld [vmem:[%s1706_s3 + $0x18] sm:$0xff] }
 0x2cf   : > { %v1305_v42 = vpack.c.bf16 %v1026_v38, %v1025_v37 }
 0x2d0   : > { %1363 = vpow2.f32 %v398_v39 }
 0x2d1   : > { %1365 = vpow2.f32 %v395_v43 }
 0x2da   : > { %v1364_v40 = vpop.eup %1363 }
 0x2db   : > { %1252 = vmatmul.mubr.msk.f32.vlgmr.msra.gmra.mrb[2].mxu1 %vm309_vm2, %v1364_v40  ;;  %v1366_v44 = vpop.eup %1365 }
 0x2dc   : > { %1255 = vmatpush3.xpose.msk.msra.mxu1 %vm309_vm2, %v488_v15  ;;  %1256 = vmatprep.mubr.msk.f32.mxu1 %vm1452_vm0, %v1453_v6  ;;  %v400_v45 = vmul.f32 0.0, %v1366_v44 }
 0x2dd   : > { %1259 = vmatprep.subr.mxu1 %v1453_v6 }
 0x2df   : > { %1257 = vmatmul.mubr.msk.f32.vlgmr.msra.gmra.mrb[4].mxu1 %vm309_vm2, %v486_v16 }
 0x2e0   : > { %1260 = vmatpush3.msra.mxu1 %v580_v41  ;;  %1261 = vmatprep.mubr.msk.f32.mxu1 %vm1452_vm0, %v1453_v6 }
 0x2e1   : > { %1269 = vmatprep.subr.mxu1 %v1453_v6 }
 0x2fe   : > { %v745_v53 = vpop.xlane.xlu0 %744 }
 0x2ff   : > { %v746_v54 = vmax.f32 %v745_v53, -1e+30 }
 0x301   : > { %v750_v55 = vsub.f32 %v742_v32, %v746_v54  ;;  %v747_v19 = vsub.f32 -1e+30, %v746_v54 }
 0x302   : > { %v924_v59 = vpop.xlane.xlu0 %923 }
 0x303   : > { %v751_v56 = vmul.f32 1.442695, %v750_v55  ;;  %v925_v60 = vmax.f32 %v924_v59, -1e+30  ;;  %v748_v21 = vmul.f32 1.442695, %v747_v19 }
 0x305   : > { %1367 = vpow2.f32 %v751_v56  ;;  %v929_v63 = vsub.f32 %v921_v34, %v925_v60  ;;  %v926_v22 = vsub.f32 -1e+30, %v925_v60  ;;  %v1024_v34 = vld [vmem:[%s1706_s3 + $0x8] sm:$0xff] }
 0x306   : > { %v938_v9 = vpop.permute.xlu0 %937  ;;  %v1302_v36 = vpack.c.bf16 %v1024_v34, %v1023_v33 }
 0x307   : > { %v930_v2 = vmul.f32 1.442695, %v929_v63 }
 0x308   : > { %1303 = vmatpush3.bf16.msra.mxu0 %v1302_v36 }
 0x309   : > { %1304 = vmatprep.subr.bf16.mxu0 %v1451_v3 }
 0x30c   : > { %1306 = vmatpush3.bf16.msra.mxu0 %v1305_v42 }
 0x30f   : > { %v1368_v57 = vpop.eup %1367 }
 0x310   : > { %v754_v58 = vsel %vm309_vm2, %v1368_v57, 0.0 }
 0x3ae   : > { %v477_v46 = vpop.f32.mrb[2].mxu1 }
 0x3af   : > { %v481_v47 = vadd.f32 %v477_v46, %v400_v45  ;;  %v1253_v48 = vpop.f32.mrb[3].mxu1 }
 0x3b2   : > { %v559_v49 = vpop.f32.mrb[4].mxu1 }
 0x3b3   : > { %v563_v50 = vsel %vm388_vm3, %v559_v49, -1e+30  ;;  %v1258_v51 = vpop.f32.mrb[5].mxu1 }
 0x3b4   : > { %v564_v52 = vsel %vm309_vm2, %v563_v50, -inf }
 0x3b5   : > { %565 = vmax.xlane.f32.xlu1 %v564_v52 }
 0x3c6   : > { %758 = vrot.lane.b32.xlu1 %v1578_v11, %s1464_s14  ;;  %v401_v11 = vsel %vm309_vm2, %v1364_v40, 0.0  ;;  %s1204_s14 = sshll.u32 %s1520_s22, 7  ;;  %s1468_s22 = smov [#allocation3]  }
 0x3c7   : > { %s1660_s25 = scalar_lea.hbm %s1708_s5, %s1204_s14  ;;  %s1391_s6 = sshll.u32 %s1468_s22, 4  ;;  %s1392_s6 = int_to_ptr.vmem [resolvable:$false] %s1391_s6 }
 0x3c8   : > { %p1394_p0 = scmp.lt.s32.totalorder %s1662_s16, %s1392_s6 }
 0x3ea   : > { %755 = vadd.xlane.f32.xlu1 %v754_v58 }
 0x442   : > { %v566_v61 = vpop.xlane.xlu1 %565 }
 0x443   : > { %v567_v62 = vmax.f32 %v566_v61, -1e+30 }
 0x445   : > { %v571_v0 = vsub.f32 %v563_v50, %v567_v62  ;;  %v568_v18 = vsub.f32 -1e+30, %v567_v62 }
 0x446   : > { %v759_v5 = vpop.permute.xlu1 %758 }
 0x447   : > { %v572_v1 = vmul.f32 1.442695, %v571_v0  ;;  %v569_v20 = vmul.f32 1.442695, %v568_v18 }
 0x449   : > { %1369 = vpow2.f32 %v572_v1 }
 0x44a   : > { %1371 = vpow2.f32 %v930_v2 }
 0x453   : > { %v1370_v4 = vpop.eup %1369 }
 0x454   : > { %1262 = vmatmul.mubr.msk.f32.vlgmr.msra.gmra.mrb[6].mxu1 %vm309_vm2, %v1370_v4  ;;  %v575_v7 = vsel %vm309_vm2, %v1370_v4, 0.0  ;;  %v1372_v8 = vpop.eup %1371 }
 0x455   : > { %1270 = vmatpush3.msra.mxu1 %v759_v5  ;;  %576 = vadd.xlane.f32.xlu0 %v575_v7  ;;  %v933_v10 = vsel %vm309_vm2, %v1372_v8, 0.0 }
 0x456   : > { %1271 = vmatprep.mubr.msk.f32.mxu1 %vm1452_vm0, %v1453_v6  ;;  %1279 = vmatprep.subr.mxu1 %v1453_v6 }
 0x458   : > { %1272 = vmatmul.mubr.msk.f32.vlgmr.msra.gmra.mrb[8].mxu1 %vm309_vm2, %v1368_v57  ;;  %v1201_v57 = vld [vmem:[%s1707_s4] ss:$0 sm:$0xff] }
 0x459   : > { %1280 = vmatpush3.msra.mxu1 %v938_v9  ;;  %934 = vadd.xlane.f32.xlu0 %v933_v10 }
 0x45a   : > { %1281 = vmatprep.mubr.msk.f32.mxu1 %vm1452_vm0, %v1453_v6  ;;  %v927_v6 = vmul.f32 1.442695, %v926_v22 }
 0x45c   : > { %1282 = vmatmul.mubr.msk.f32.vlgmr.msra.gmra.mrb[10].mxu1 %vm309_vm2, %v1372_v8 }
 0x45d   : > { %402 = vadd.xlane.f32.xlu0 %v401_v11 }
 0x477   : > { %v756_v27 = vpop.xlane.xlu1 %755 }
 0x4e2   : > { %v577_v12 = vpop.xlane.xlu0 %576 }
 0x4e6   : > { %v935_v13 = vpop.xlane.xlu0 %934 }
 0x4ea   : > { %v403_v14 = vpop.xlane.xlu0 %402 }
 0x4eb   : > { %v404_v15 = vadd.f32 %v403_v14, %v400_v45 }
 0x4ed   : > { %1373 = vrcp.f32 %v404_v15 }
 0x4ee   : > { %1375 = vpow2.f32 %v569_v20 }
 0x4ef   : > { %1377 = vpow2.f32 %v748_v21 }
 0x4f0   : > { %1379 = vpow2.f32 %v927_v6 }
 0x4f7   : > { %v1374_v16 = vpop.eup %1373 }
 0x4f8   : > { %v483_v17 = vmul.f32 %v1374_v16, %v481_v47  ;;  %v1376_v23 = vpop.eup %1375 }
 0x4f9   : > { %v574_v24 = vmul.f32 0.0, %v1376_v23  ;;  %v1378_v25 = vpop.eup %1377 }
 0x4fa   : > { %484 = vst.msk [vmem:[#allocation2] sm:$0xff] %vm309_vm2, %v483_v17  ;;  %v753_v28 = vmul.f32 0.0, %v1378_v25  ;;  %v1380_v29 = vpop.eup %1379 }
 0x4fb   : > { %v578_v26 = vadd.f32 %v577_v12, %v574_v24  ;;  %v932_v31 = vmul.f32 0.0, %v1380_v29 }
 0x4fc   : > { %v757_v30 = vadd.f32 %v756_v27, %v753_v28 }
 0x4fd   : > { %1381 = vrcp.f32 %v578_v26  ;;  %v936_v32 = vadd.f32 %v935_v13, %v932_v31 }
 0x4fe   : > { %1383 = vrcp.f32 %v757_v30 }
 0x4ff   : > { %1385 = vrcp.f32 %v936_v32 }
 0x507   : > { %v1382_v41 = vpop.eup %1381 }
 0x508   : > { %v1384_v47 = vpop.eup %1383 }
 0x509   : > { %v1386_v52 = vpop.eup %1385 }
 0x527   : > { %v651_v35 = vpop.f32.mrb[6].mxu1 }
 0x528   : > { %v655_v39 = vadd.f32 %v651_v35, %v574_v24  ;;  %v1263_v40 = vpop.f32.mrb[7].mxu1 }
 0x52a   : > { %v657_v43 = vmul.f32 %v1382_v41, %v655_v39 }
 0x52b   : > { %v830_v44 = vpop.f32.mrb[8].mxu1 }
 0x52c   : > { %v834_v45 = vadd.f32 %v830_v44, %v753_v28  ;;  %v1273_v46 = vpop.f32.mrb[9].mxu1  ;;  %659 = vrot.lane.b32.xlu0 %v657_v43, %s1465_s7  ;;  %s1393_s7 = scalar_lea.vmem %s1392_s6, 256 }
 0x52d   : > { %p1395_p1 = scmp.lt.s32.totalorder %s1393_s7, %s1387_s30 }
 0x52e   : > { %v836_v48 = vmul.f32 %v1384_v47, %v834_v45 }
 0x52f   : > { %v1009_v49 = vpop.f32.mrb[10].mxu1  ;;  %p1396_p2 = por %p1395_p1, %p1394_p0 }
 0x530   : > { %v1013_v50 = vadd.f32 %v1009_v49, %v932_v31  ;;  %838 = vrot.lane.b32.xlu1 %v836_v48, %s1466_s8  ;;  %v1283_v51 = vpop.f32.mrb[11].mxu1 }
 0x531   : > { %p1397_p3 = pnand %p1396_p2, %p1390_p13 }
 0x532   : > { %v1015_v53 = vmul.f32 %v1386_v52, %v1013_v50 }
 0x534   : > { %1017 = vrot.lane.b32.xlu0 %v1015_v53, %s1467_s9 }
 0x59e   : > { %v660_v3 = vpop.permute.xlu0 %659 }
 0x59f   : > { %663 = vst.msk [vmem:[#allocation2] sm:$0xff] %vm662_vm4, %v660_v3 }
 0x5a2   : > { %v839_v54 = vpop.permute.xlu1 %838 }
 0x5a3   : > { %842 = vst.msk [vmem:[#allocation2] sm:$0xff] %vm841_vm5, %v839_v54 }
 0x5a6   : > { %v1018_v55 = vpop.permute.xlu0 %1017 }
 0x5a7   : > { %1021 = vst.msk [vmem:[#allocation2] sm:$0xff] %vm1020_vm6, %v1018_v55 }
 0x5ae   : > { %v1022_v56 = vld [vmem:[#allocation2] sm:$0xff] }
 0x5af   : > { %1293 = vmatmul.mubr.msk.f32.vlgmr.msra.gmra.mrb[6].mxu0 %vm232_vm1, %v1022_v56 }
 0x682   : > { %v1103_v58 = vpop.f32.mrb[6].mxu0 }
 0x683   : > { %v1104_v59 = vadd.f32 %v1201_v57, %v1103_v58  ;;  %v1294_v60 = vpop.f32.mrb[7].mxu0 }
 0x685   : > { %1107 = vst.msk [vmem:[%s215_s15] sm:$0xff] %vm232_vm1, %v1104_v59 }
 0x686   : > { %1400 = shalt.err (!%p1397_p3)
}
 0x687   : > { %s1401_s8 = scalar_lea.hbm %s1660_s25, 128  ;;  %s1405_s11 = scalar_lea.hbm %s1708_s5, 256 }
 0x688   : > { %p1402_p4 = scmp.ne.s32.totalorder %s1660_s25, %s1401_s8  ;;  %p1406_p9 = scmp.lt.u32.totalorder %s1660_s25, %s1708_s5 }
 0x689   : > { %p1407_p10 = scmp.lt.u32.totalorder %s1405_s11, %s1401_s8  ;;  %p1409_p12 = scmp.lt.u32.totalorder %s1401_s8, %s1660_s25 }
 0x68a   : > { %p1403_p7 = pnand %p1402_p4, %p1537_p5 }
 0x68b   : > { %p1408_p11 = por %p1407_p10, %p1406_p9 }
 0x68c   : > { %p1404_p8 = pneg %p1403_p7 }
 0x68d   : > { %p1410_p13 = por %p1409_p12, %p1408_p11 }
 0x68f   : > { %p1411_p0 = pnand %p1410_p13, %p1404_p8 }
 0x691   : > { %1414 = shalt.err (!%p1411_p0)
}
 0x692   : > { %1307 = dma.vmem_to_hbm [thread:$0]  (%p1537_p5), %s1662_s16, 128, %s1660_s25, %s1109_s26  }
 0x693 PF: > { %p1313_p1 = scmp.ge.s32.totalorder %s1449_s21, 2  ;;  %s1134_s14 = sand.u32 1, %s1437_s18  }
 0x694   : > { %s1135_s15 = scalar_lea.sflag [#allocation4], %s1134_s14 }
 0x695   : > { %p1310_p2 = pnand %p1313_p1, %p1541_p6 }
 0x697   : > { %1432 = dma.done.wait (!%p1310_p2), %s1135_s15, 128  }
 0x698   : > { %1434 = vsyncadd (!%p1310_p2), %s1135_s15, 4294967168  ;;  %p15_p3 = scmp.ge.s32.totalorder %s1524_s24, 4   ;;  %s1711_s18 = smov %s1441_s19 }
 0x699   : > { %s1712_s19 = smov %s1445_s20  ;;  %s1713_s20 = smov %s1535_s27 }
 0x69a   : > { %s1714_s21 = smov %s1524_s24  ;;  %17 = sbr.rel (!%p15_p3) target bundleno = 3 (0x3), region = 75 }
 0x6a1   :  { %1140 = vsyncpa [#allocation4], 1 }
 0x6a2   :  { %1142 = vsyncpa [#allocation4 + $0x1], 1 }

</bundles_post_ra>
